<compile_context>
chip_gen: v7x
topology: tpu7x:2x2x1
jax: 0.10.0
libtpu: 0.0.40
codegen_flags: <defaults>
</compile_context>

<pallas_src>
import functools

import jax
import jax.numpy as jnp
from jax import lax
from jax.experimental import pallas as pl
from jax.experimental.pallas import tpu as pltpu

NEG_FILL = -1e16
LEAKY_SLOPE = 0.01  # torch.nn.LeakyReLU default negative_slope


def _leaky_relu(x):
    return jnp.where(x >= 0, x, LEAKY_SLOPE * x)


def _pick_row_tile(n):
    """Largest power-of-two-ish row tile (multiple of 8) dividing n."""
    for t in (512, 256, 128, 64, 32, 16, 8):
        if n % t == 0:
            return t
    return n


def _vmem_limit_bytes():
    """Per-generation scoped-VMEM budget: ~75% of physical, capped at 100 MiB.

    v5e/v6e (128 MiB physical) -> 96 MiB; v7x (64 MiB physical) -> 48 MiB.
    Falls back to a v7x-safe 48 MiB if the hardware query is unavailable.
    """
    try:
        phys = pltpu.get_tpu_info().vmem_capacity_bytes
    except Exception:
        phys = 64 * 1024 * 1024
    if not phys or phys <= 0:
        phys = 64 * 1024 * 1024
    return int(min(0.75 * phys, 100 * 1024 * 1024))


# ---------------------------------------------------------------------------
# Kernel 1: all attention heads + fused out-projection of LeakyReLU(concat).
# Grid cell = (batch element, query-row tile).
# ---------------------------------------------------------------------------
def _gat_heads_kernel(x_ref, g_ref, wh_ref, bh_ref, wo_ref, h2_ref, h_scr,
                      *, n_heads, hid_c, tq, mxu_dtype):
    r = pl.program_id(1)

    # Project all heads ONCE per batch element (row tiles run sequentially on
    # the "arbitrary" axis); split into a per-head scratch so every later
    # access is a leading-dim index — no per-tile lane/sublane slicing.
    @pl.when(r == 0)
    def _():
        x = x_ref[...].astype(mxu_dtype)                              # [N, C]
        w = wh_ref[...].astype(mxu_dtype)                             # [C, H]
        h_all = jnp.dot(x, w, preferred_element_type=jnp.float32)     # [N, H]
        for k in range(n_heads):
            h_scr[k] = h_all[:, k * hid_c:(k + 1) * hid_c].astype(h_scr.dtype)

    g = g_ref[...].astype(jnp.float32)                                # [TQ, N]
    b_all = bh_ref[...].astype(jnp.float32)                           # [heads, 1, hid]
    row0 = pl.multiple_of(r * tq, tq)

    out_c = h2_ref.shape[-1]
    h2 = jnp.zeros((tq, out_c), jnp.float32)
    for k in range(n_heads):                       # static unroll, n_heads small
        h_k = h_scr[k]                                       # [N, hid] keys/values
        q_k = h_scr[k, pl.ds(row0, tq), :]                   # [TQ, hid] queries
        # scores = (q_k h_k^T) * graph rows — transposed contraction on the MXU.
        s = lax.dot_general(q_k, h_k, (((1,), (1,)), ((), ())),
                            preferred_element_type=jnp.float32) * g
        # faithful to torch: masked_fill_(scores == 0, -1e16)
        s = jnp.where(s == 0.0, NEG_FILL, s)
        m = jnp.max(s, axis=-1, keepdims=True)
        p = jnp.exp(s - m)          # f32 exp (v5e has no bf16 EUP)
        # exact divide: these attention weights feed the next layer's logits,
        # where approximate-reciprocal error would be exp-amplified.
        attn = p / jnp.sum(p, axis=-1, keepdims=True)
        out_k = jnp.dot(attn.astype(mxu_dtype), h_k,
                        preferred_element_type=jnp.float32) + b_all[k]
        # h2 += LeakyReLU(out_k) @ W_out[k]  (== LeakyReLU(concat) @ W_out)
        h2 = h2 + jnp.dot(_leaky_relu(out_k).astype(mxu_dtype),
                          wo_ref[k].astype(mxu_dtype),
                          preferred_element_type=jnp.float32)
    h2_ref[...] = h2.astype(h2_ref.dtype)


# ---------------------------------------------------------------------------
# Kernel 2: out-attention layer on the already-projected h2.
# Grid cell = (batch element, query-row tile); row tiles fully independent.
# ---------------------------------------------------------------------------
def _gat_out_kernel(h_ref, g_ref, bo_ref, o_ref, *, tq, mxu_dtype):
    r = pl.program_id(1)
    row0 = pl.multiple_of(r * tq, tq)

    h = h_ref[...].astype(mxu_dtype)                     # [N, out_c] keys/values
    q = h_ref[pl.ds(row0, tq), :].astype(mxu_dtype)      # [TQ, out_c] queries
    g = g_ref[...].astype(jnp.float32)                   # [TQ, N]

    s = lax.dot_general(q, h, (((1,), (1,)), ((), ())),
                        preferred_element_type=jnp.float32) * g
    s = jnp.where(s == 0.0, NEG_FILL, s)
    m = jnp.max(s, axis=-1, keepdims=True)
    p = jnp.exp(s - m)
    # final layer: approximate reciprocal on the otherwise-idle EUP slot is
    # safe here (its error appears only linearly in the output).
    attn = p * pl.reciprocal(jnp.sum(p, axis=-1, keepdims=True), approx=True)
    out = jnp.dot(attn.astype(mxu_dtype), h, preferred_element_type=jnp.float32) \
        + bo_ref[...].astype(jnp.float32)
    o_ref[...] = _leaky_relu(out).astype(o_ref.dtype)


def gat_subnet_forward(x, graph, params, *, row_tile=None, use_bf16_matmul=True):
    """GATSubNet.forward as two row-tiled pallas_calls. x: [B,N,C] -> [B,N,out_c]."""
    B, N, C = x.shape
    heads = params["heads"]
    n_heads = len(heads)
    hid_c = heads[0][0].shape[1]
    w_out, b_out = params["out"]
    out_c = w_out.shape[1]
    H = n_heads * hid_c

    tq = _pick_row_tile(N) if row_tile is None else row_tile
    # TODO(synk): pad ragged N to a row-tile multiple (padded adjacency rows/
    # cols must stay 0 so the s==0 -> -1e16 path neutralizes them).
    assert N % tq == 0, (N, tq)
    assert tq == N or tq % 8 == 0, tq
    n_row = N // tq

    mxu_dtype = jnp.bfloat16 if use_bf16_matmul else jnp.float32
    vmem_limit = _vmem_limit_bytes()

    # Stack per-head parameters: one weight slab for the projection matmul,
    # and head-major (leading-dim indexed) layouts for bias / W_out so the
    # kernel never slices lanes/sublanes inside the head loop.
    w_heads = jnp.concatenate([w for (w, _) in heads], axis=1)               # [C, H]
    b_heads = jnp.stack([b for (_, b) in heads], axis=0).reshape(n_heads, 1, hid_c)
    w_out_h = w_out.reshape(n_heads, hid_c, out_c)                           # head-major rows

    # ---- layer 1: all heads + fused out-projection of LeakyReLU(concat) ----
    k1 = functools.partial(_gat_heads_kernel, n_heads=n_heads, hid_c=hid_c,
                           tq=tq, mxu_dtype=mxu_dtype)
    h2 = pl.pallas_call(
        k1,
        out_shape=jax.ShapeDtypeStruct((B, N, out_c), jnp.float32),
        grid_spec=pltpu.PrefetchScalarGridSpec(
            num_scalar_prefetch=0,
            grid=(B, n_row),
            in_specs=[
                pl.BlockSpec((None, N, C), lambda b, r: (b, 0, 0)),          # x (resident per batch)
                pl.BlockSpec((tq, N), lambda b, r: (r, 0)),                  # graph row block
                pl.BlockSpec((C, H), lambda b, r: (0, 0)),                   # stacked head W
                pl.BlockSpec((n_heads, 1, hid_c), lambda b, r: (0, 0, 0)),   # head biases
                pl.BlockSpec((n_heads, hid_c, out_c), lambda b, r: (0, 0, 0)),  # W_out, head-major
            ],
            out_specs=pl.BlockSpec((None, tq, out_c), lambda b, r: (b, r, 0)),
            scratch_shapes=[pltpu.VMEM((n_heads, N, hid_c), mxu_dtype)],
        ),
        compiler_params=pltpu.CompilerParams(
            # row axis must stay "arbitrary": the projection scratch is filled
            # at row tile 0 and reused by later tiles of the same batch.
            dimension_semantics=("parallel", "arbitrary"),
            vmem_limit_bytes=vmem_limit),
    )(x, graph, w_heads, b_heads, w_out_h)

    # ---- layer 2: out-attention over the complete h2 ----
    k2 = functools.partial(_gat_out_kernel, tq=tq, mxu_dtype=mxu_dtype)
    return pl.pallas_call(
        k2,
        out_shape=jax.ShapeDtypeStruct((B, N, out_c), jnp.float32),
        grid_spec=pltpu.PrefetchScalarGridSpec(
            num_scalar_prefetch=0,
            grid=(B, n_row),
            in_specs=[
                pl.BlockSpec((None, N, out_c), lambda b, r: (b, 0, 0)),      # h2 (resident per batch)
                pl.BlockSpec((tq, N), lambda b, r: (r, 0)),                  # graph row block
                pl.BlockSpec((1, out_c), lambda b, r: (0, 0)),               # out bias
            ],
            out_specs=pl.BlockSpec((None, tq, out_c), lambda b, r: (b, r, 0)),
        ),
        compiler_params=pltpu.CompilerParams(
            # tiles are fully independent here -> shard both axes (v7x 2 TCs).
            dimension_semantics=("parallel", "parallel"),
            vmem_limit_bytes=vmem_limit),
    )(h2, graph, b_out.reshape(1, out_c))


# ---------------------------------------------------------------------------
# Pure-JAX reference (mirrors the PyTorch code) for correctness checking.
# ---------------------------------------------------------------------------
def _gat_layer_ref(x, graph, w, b):
    h = x @ w
    s = jnp.einsum("bnd,bmd->bnm", h, h) * graph[None]
    s = jnp.where(s == 0.0, NEG_FILL, s)
    a = jax.nn.softmax(s, axis=-1)
    return jnp.einsum("bnm,bmd->bnd", a, h) + b


def _gat_subnet_ref(x, graph, params):
    outs = jnp.concatenate(
        [_gat_layer_ref(x, graph, w, b) for (w, b) in params["heads"]], axis=-1)
    outs = _leaky_relu(outs)
    w_o, b_o = params["out"]
    return _leaky_relu(_gat_layer_ref(outs, graph, w_o, b_o))


def init_params(key, in_c, hid_c, out_c, n_heads):
    """Deterministic normal init, matching nn.init.normal_ shapes."""
    keys = jax.random.split(key, 2 * n_heads + 2)
    heads = []
    for h in range(n_heads):
        w = jax.random.normal(keys[2 * h], (in_c, hid_c), jnp.float32)
        b = jax.random.normal(keys[2 * h + 1], (hid_c,), jnp.float32)
        heads.append((w, b))
    w_o = jax.random.normal(keys[-2], (hid_c * n_heads, out_c), jnp.float32)
    b_o = jax.random.normal(keys[-1], (out_c,), jnp.float32)
    return {"heads": heads, "out": (w_o, b_o)}


if __name__ == "__main__":
    B, N, in_c, hid_c, out_c, n_heads = 2, 16, 4, 8, 4, 2
    row_tile = 8   # 2 query-row tiles per batch element -> exercises the tiling

    key = jax.random.PRNGKey(0)
    k_x, k_g, k_p = jax.random.split(key, 3)

    x = jax.random.normal(k_x, (B, N, in_c), jnp.float32)
    # Deterministic binary adjacency with self-loops.
    graph = jax.random.bernoulli(k_g, 0.4, (N, N)).astype(jnp.float32)
    graph = jnp.maximum(graph, jnp.eye(N, dtype=jnp.float32))

    params = init_params(k_p, in_c, hid_c, out_c, n_heads)

    # Exact (f32 MXU) path: the correctness gate against the pure-JAX reference.
    fwd_f32 = jax.jit(functools.partial(
        gat_subnet_forward, row_tile=row_tile, use_bf16_matmul=False))
    out = jax.block_until_ready(fwd_f32(x, graph, params))
    ref = _gat_subnet_ref(x, graph, params)
    assert out.shape == (B, N, out_c), out.shape
    # tolerance accounts for the approximate EUP reciprocal in the final softmax
    assert jnp.allclose(out, ref, rtol=3e-3, atol=3e-3), (
        float(jnp.max(jnp.abs(out - ref))))

    # bf16-MXU fast path (production default for v6e/v7x).  With unit-normal
    # init the attention logits are O(10^2), so bf16 operand rounding can
    # legitimately reorder near-tied attention weights vs. the f32 reference;
    # only shape/finiteness is asserted for this path.
    fwd_bf16 = jax.jit(functools.partial(
        gat_subnet_forward, row_tile=row_tile, use_bf16_matmul=True))
    out_bf16 = jax.block_until_ready(fwd_bf16(x, graph, params))
    assert out_bf16.shape == (B, N, out_c), out_bf16.shape
    assert bool(jnp.isfinite(out_bf16).all())

    print("KERNEL_OK")
</pallas_src>

<mosaic_0001>
module attributes {stable_mosaic.version = 11 : i64} {
  func.func @_gat_out_kernel(%arg0: i32, %arg1: i32, %arg2: memref<1x16x4xf32, #tpu.memory_space<vmem>>, %arg3: memref<8x16xf32, #tpu.memory_space<vmem>>, %arg4: memref<1x4xf32, #tpu.memory_space<vmem>>, %arg5: memref<1x8x4xf32, #tpu.memory_space<vmem>>) attributes {dimension_semantics = [#tpu.dimension_semantics<parallel>, #tpu.dimension_semantics<parallel>], iteration_bounds = array<i64: 2, 2>, scalar_prefetch = 0 : i64, scratch_operands = 0 : i64, tpu.core_type = #tpu.core_type<tc>, window_params = [{transform_indices = @transform_0, window_bounds = array<i64: 1, 16, 4>}, {transform_indices = @transform_1, window_bounds = array<i64: 8, 16>}, {pipeline_mode = #tpu.pipeline_mode<synchronous>, transform_indices = @transform_2, window_bounds = array<i64: 1, 4>}, {transform_indices = @transform_3, window_bounds = array<i64: 1, 8, 4>}]} {
    %c8_i32 = arith.constant 8 : i32
    %0 = arith.muli %arg1, %c8_i32 : i32
    %1 = tpu.assume_multiple %0, 8 : i32
    %c0 = arith.constant 0 : index
    %c0_0 = arith.constant 0 : index
    %c0_1 = arith.constant 0 : index
    %2 = vector.load %arg2[%c0, %c0_0, %c0_1] : memref<1x16x4xf32, #tpu.memory_space<vmem>>, vector<1x16x4xf32>
    %3 = vector.shape_cast %2 : vector<1x16x4xf32> to vector<16x4xf32>
    %c0_2 = arith.constant 0 : index
    %4 = arith.index_cast %1 : i32 to index
    %c0_3 = arith.constant 0 : index
    %5 = vector.load %arg2[%c0_2, %4, %c0_3] : memref<1x16x4xf32, #tpu.memory_space<vmem>>, vector<1x8x4xf32>
    %6 = vector.shape_cast %5 : vector<1x8x4xf32> to vector<8x4xf32>
    %c0_4 = arith.constant 0 : index
    %c0_5 = arith.constant 0 : index
    %7 = vector.load %arg3[%c0_4, %c0_5] : memref<8x16xf32, #tpu.memory_space<vmem>>, vector<8x16xf32>
    %cst = arith.constant dense<0.000000e+00> : vector<8x16xf32>
    %8 = tpu.matmul %6, %3, %cst {dimension_numbers = #tpu.dot_dimension_numbers<[1], [1], [0], [0], [0, 0, 1, 0], [], []>} : vector<8x4xf32>, vector<16x4xf32>, vector<8x16xf32> -> vector<8x16xf32>
    %9 = arith.mulf %8, %7 : vector<8x16xf32>
    %cst_6 = arith.constant 0.000000e+00 : f32
    %10 = vector.broadcast %cst_6 : f32 to vector<8x16xf32>
    %11 = arith.cmpf oeq, %9, %10 : vector<8x16xf32>
    %cst_7 = arith.constant -1.000000e+16 : f32
    %12 = vector.broadcast %cst_7 : f32 to vector<8x16xf32>
    %13 = arith.select %11, %12, %9 : vector<8x16xi1>, vector<8x16xf32>
    %cst_8 = arith.constant dense<0xFF800000> : vector<8xf32>
    %14 = vector.multi_reduction <maximumf>, %13, %cst_8 [1] : vector<8x16xf32> to vector<8xf32>
    %15 = vector.shape_cast %14 : vector<8xf32> to vector<8x1xf32>
    %16 = vector.broadcast %15 : vector<8x1xf32> to vector<8x16xf32>
    %17 = arith.subf %13, %16 : vector<8x16xf32>
    %18 = math.exp %17 : vector<8x16xf32>
    %cst_9 = arith.constant dense<0.000000e+00> : vector<8xf32>
    %19 = vector.multi_reduction <add>, %18, %cst_9 [1] : vector<8x16xf32> to vector<8xf32>
    %20 = vector.shape_cast %19 : vector<8xf32> to vector<8x1xf32>
    %21 = tpu.reciprocal %20 {approx = true} : vector<8x1xf32> -> vector<8x1xf32>
    %22 = vector.broadcast %21 : vector<8x1xf32> to vector<8x16xf32>
    %23 = arith.mulf %18, %22 : vector<8x16xf32>
    %cst_10 = arith.constant dense<0.000000e+00> : vector<8x4xf32>
    %24 = tpu.matmul %23, %3, %cst_10 {dimension_numbers = #tpu.dot_dimension_numbers<[1], [0], [0], [1], [0, 0, 1, 1], [], []>} : vector<8x16xf32>, vector<16x4xf32>, vector<8x4xf32> -> vector<8x4xf32>
    %c0_11 = arith.constant 0 : index
    %c0_12 = arith.constant 0 : index
    %25 = vector.load %arg4[%c0_11, %c0_12] : memref<1x4xf32, #tpu.memory_space<vmem>>, vector<1x4xf32>
    %26 = vector.broadcast %25 : vector<1x4xf32> to vector<8x4xf32>
    %27 = arith.addf %24, %26 : vector<8x4xf32>
    %cst_13 = arith.constant 0.000000e+00 : f32
    %28 = vector.broadcast %cst_13 : f32 to vector<8x4xf32>
    %29 = arith.cmpf oge, %27, %28 : vector<8x4xf32>
    %cst_14 = arith.constant 0.00999999977 : f32
    %30 = vector.broadcast %cst_14 : f32 to vector<8x4xf32>
    %31 = arith.mulf %30, %27 : vector<8x4xf32>
    %32 = arith.select %29, %27, %31 : vector<8x4xi1>, vector<8x4xf32>
    %c0_15 = arith.constant 0 : index
    %c0_16 = arith.constant 0 : index
    %c0_17 = arith.constant 0 : index
    %33 = vector.load %arg5[%c0_15, %c0_16, %c0_17] : memref<1x8x4xf32, #tpu.memory_space<vmem>>, vector<1x8x4xf32>
    %34 = vector.shape_cast %33 : vector<1x8x4xf32> to vector<8x4xf32>
    %35 = vector.shape_cast %32 : vector<8x4xf32> to vector<1x8x4xf32>
    tpu.vector_store %arg5[%c0_15, %c0_16, %c0_17], %35 {strides = array<i32>} : memref<1x8x4xf32, #tpu.memory_space<vmem>>, vector<1x8x4xf32>,
    return
  }
  func.func @transform_0(%arg0: i32, %arg1: i32) -> (i32, i32, i32) {
    %c0_i32 = arith.constant 0 : i32
    %c0_i32_0 = arith.constant 0 : i32
    %c0_i32_1 = arith.constant 0 : i32
    return %arg0, %c0_i32, %c0_i32_0 : i32, i32, i32
  }
  func.func @transform_1(%arg0: i32, %arg1: i32) -> (i32, i32) {
    %c0_i32 = arith.constant 0 : i32
    %c0_i32_0 = arith.constant 0 : i32
    return %arg1, %c0_i32 : i32, i32
  }
  func.func @transform_2(%arg0: i32, %arg1: i32) -> (i32, i32) {
    %c0_i32 = arith.constant 0 : i32
    %c0_i32_0 = arith.constant 0 : i32
    %c0_i32_1 = arith.constant 0 : i32
    return %c0_i32, %c0_i32_0 : i32, i32
  }
  func.func @transform_3(%arg0: i32, %arg1: i32) -> (i32, i32, i32) {
    %c0_i32 = arith.constant 0 : i32
    %c0_i32_0 = arith.constant 0 : i32
    return %arg0, %arg1, %c0_i32 : i32, i32, i32
  }
}

module attributes {stable_mosaic.version = 11 : i64} {
  func.func @_gat_heads_kernel(%arg0: i32, %arg1: i32, %arg2: memref<1x16x4xf32, #tpu.memory_space<vmem>>, %arg3: memref<8x16xf32, #tpu.memory_space<vmem>>, %arg4: memref<4x16xf32, #tpu.memory_space<vmem>>, %arg5: memref<2x1x8xf32, #tpu.memory_space<vmem>>, %arg6: memref<2x8x4xf32, #tpu.memory_space<vmem>>, %arg7: memref<1x8x4xf32, #tpu.memory_space<vmem>>, %arg8: memref<2x16x8xf32, #tpu.memory_space<vmem>>) attributes {dimension_semantics = [#tpu.dimension_semantics<parallel>, #tpu.dimension_semantics<arbitrary>], iteration_bounds = array<i64: 2, 2>, scalar_prefetch = 0 : i64, scratch_operands = 1 : i64, tpu.core_type = #tpu.core_type<tc>, window_params = [{transform_indices = @transform_0, window_bounds = array<i64: 1, 16, 4>}, {transform_indices = @transform_1, window_bounds = array<i64: 8, 16>}, {pipeline_mode = #tpu.pipeline_mode<synchronous>, transform_indices = @transform_2, window_bounds = array<i64: 4, 16>}, {pipeline_mode = #tpu.pipeline_mode<synchronous>, transform_indices = @transform_3, window_bounds = array<i64: 2, 1, 8>}, {pipeline_mode = #tpu.pipeline_mode<synchronous>, transform_indices = @transform_4, window_bounds = array<i64: 2, 8, 4>}, {transform_indices = @transform_5, window_bounds = array<i64: 1, 8, 4>}]} {
    %c0_i32 = arith.constant 0 : i32
    %0 = arith.cmpi eq, %arg1, %c0_i32 : i32
    %1 = arith.extui %0 : i1 to i32
    %c0_i32_0 = arith.constant 0 : i32
    %2 = arith.cmpi ne, %1, %c0_i32_0 : i32
    scf.if %2 {
      %c0_41 = arith.constant 0 : index
      %c0_42 = arith.constant 0 : index
      %c0_43 = arith.constant 0 : index
      %79 = vector.load %arg2[%c0_41, %c0_42, %c0_43] : memref<1x16x4xf32, #tpu.memory_space<vmem>>, vector<1x16x4xf32>
      %80 = vector.shape_cast %79 : vector<1x16x4xf32> to vector<16x4xf32>
      %c0_44 = arith.constant 0 : index
      %c0_45 = arith.constant 0 : index
      %81 = vector.load %arg4[%c0_44, %c0_45] : memref<4x16xf32, #tpu.memory_space<vmem>>, vector<4x16xf32>
      %cst_46 = arith.constant dense<0.000000e+00> : vector<16x16xf32>
      %82 = tpu.matmul %80, %81, %cst_46 {dimension_numbers = #tpu.dot_dimension_numbers<[1], [0], [0], [1], [0, 0, 1, 1], [], []>} : vector<16x4xf32>, vector<4x16xf32>, vector<16x16xf32> -> vector<16x16xf32>
      %83 = vector.extract_strided_slice %82 {offsets = [0, 0], sizes = [16, 8], strides = [1, 1]} : vector<16x16xf32> to vector<16x8xf32>
      %c0_47 = arith.constant 0 : index
      %c0_48 = arith.constant 0 : index
      %c0_49 = arith.constant 0 : index
      %84 = vector.load %arg8[%c0_47, %c0_48, %c0_49] : memref<2x16x8xf32, #tpu.memory_space<vmem>>, vector<1x16x8xf32>
      %85 = vector.shape_cast %84 : vector<1x16x8xf32> to vector<16x8xf32>
      %86 = vector.shape_cast %83 : vector<16x8xf32> to vector<1x16x8xf32>
      tpu.vector_store %arg8[%c0_47, %c0_48, %c0_49], %86 {strides = array<i32>} : memref<2x16x8xf32, #tpu.memory_space<vmem>>, vector<1x16x8xf32>,
      %87 = vector.extract_strided_slice %82 {offsets = [0, 8], sizes = [16, 8], strides = [1, 1]} : vector<16x16xf32> to vector<16x8xf32>
      %c1_50 = arith.constant 1 : index
      %c0_51 = arith.constant 0 : index
      %c0_52 = arith.constant 0 : index
      %88 = vector.load %arg8[%c1_50, %c0_51, %c0_52] : memref<2x16x8xf32, #tpu.memory_space<vmem>>, vector<1x16x8xf32>
      %89 = vector.shape_cast %88 : vector<1x16x8xf32> to vector<16x8xf32>
      %90 = vector.shape_cast %87 : vector<16x8xf32> to vector<1x16x8xf32>
      tpu.vector_store %arg8[%c1_50, %c0_51, %c0_52], %90 {strides = array<i32>} : memref<2x16x8xf32, #tpu.memory_space<vmem>>, vector<1x16x8xf32>,
    } else {
    }
    %c0 = arith.constant 0 : index
    %c0_1 = arith.constant 0 : index
    %3 = vector.load %arg3[%c0, %c0_1] : memref<8x16xf32, #tpu.memory_space<vmem>>, vector<8x16xf32>
    %c0_2 = arith.constant 0 : index
    %c0_3 = arith.constant 0 : index
    %c0_4 = arith.constant 0 : index
    %4 = vector.load %arg5[%c0_2, %c0_3, %c0_4] : memref<2x1x8xf32, #tpu.memory_space<vmem>>, vector<2x1x8xf32>
    %c8_i32 = arith.constant 8 : i32
    %5 = arith.muli %arg1, %c8_i32 : i32
    %6 = tpu.assume_multiple %5, 8 : i32
    %cst = arith.constant 0.000000e+00 : f32
    %7 = vector.broadcast %cst : f32 to vector<8x4xf32>
    %c0_5 = arith.constant 0 : index
    %c0_6 = arith.constant 0 : index
    %c0_7 = arith.constant 0 : index
    %8 = vector.load %arg8[%c0_5, %c0_6, %c0_7] : memref<2x16x8xf32, #tpu.memory_space<vmem>>, vector<1x16x8xf32>
    %9 = vector.shape_cast %8 : vector<1x16x8xf32> to vector<16x8xf32>
    %c0_8 = arith.constant 0 : index
    %10 = arith.index_cast %6 : i32 to index
    %c0_9 = arith.constant 0 : index
    %11 = vector.load %arg8[%c0_8, %10, %c0_9] : memref<2x16x8xf32, #tpu.memory_space<vmem>>, vector<1x8x8xf32>
    %12 = vector.shape_cast %11 : vector<1x8x8xf32> to vector<8x8xf32>
    %cst_10 = arith.constant dense<0.000000e+00> : vector<8x16xf32>
    %13 = tpu.matmul %12, %9, %cst_10 {dimension_numbers = #tpu.dot_dimension_numbers<[1], [1], [0], [0], [0, 0, 1, 0], [], []>} : vector<8x8xf32>, vector<16x8xf32>, vector<8x16xf32> -> vector<8x16xf32>
    %14 = arith.mulf %13, %3 : vector<8x16xf32>
    %cst_11 = arith.constant 0.000000e+00 : f32
    %15 = vector.broadcast %cst_11 : f32 to vector<8x16xf32>
    %16 = arith.cmpf oeq, %14, %15 : vector<8x16xf32>
    %cst_12 = arith.constant -1.000000e+16 : f32
    %17 = vector.broadcast %cst_12 : f32 to vector<8x16xf32>
    %18 = arith.select %16, %17, %14 : vector<8x16xi1>, vector<8x16xf32>
    %cst_13 = arith.constant dense<0xFF800000> : vector<8xf32>
    %19 = vector.multi_reduction <maximumf>, %18, %cst_13 [1] : vector<8x16xf32> to vector<8xf32>
    %20 = vector.shape_cast %19 : vector<8xf32> to vector<8x1xf32>
    %21 = vector.broadcast %20 : vector<8x1xf32> to vector<8x16xf32>
    %22 = arith.subf %18, %21 : vector<8x16xf32>
    %23 = math.exp %22 : vector<8x16xf32>
    %cst_14 = arith.constant dense<0.000000e+00> : vector<8xf32>
    %24 = vector.multi_reduction <add>, %23, %cst_14 [1] : vector<8x16xf32> to vector<8xf32>
    %25 = vector.shape_cast %24 : vector<8xf32> to vector<8x1xf32>
    %26 = vector.broadcast %25 : vector<8x1xf32> to vector<8x16xf32>
    %27 = arith.divf %23, %26 : vector<8x16xf32>
    %cst_15 = arith.constant dense<0.000000e+00> : vector<8x8xf32>
    %28 = tpu.matmul %27, %9, %cst_15 {dimension_numbers = #tpu.dot_dimension_numbers<[1], [0], [0], [1], [0, 0, 1, 1], [], []>} : vector<8x16xf32>, vector<16x8xf32>, vector<8x8xf32> -> vector<8x8xf32>
    %29 = vector.extract_strided_slice %4 {offsets = [0, 0, 0], sizes = [1, 1, 8], strides = [1, 1, 1]} : vector<2x1x8xf32> to vector<1x1x8xf32>
    %30 = vector.shape_cast %29 : vector<1x1x8xf32> to vector<1x8xf32>
    %31 = vector.broadcast %30 : vector<1x8xf32> to vector<8x8xf32>
    %32 = arith.addf %28, %31 : vector<8x8xf32>
    %cst_16 = arith.constant 0.000000e+00 : f32
    %33 = vector.broadcast %cst_16 : f32 to vector<8x8xf32>
    %34 = arith.cmpf oge, %32, %33 : vector<8x8xf32>
    %cst_17 = arith.constant 0.00999999977 : f32
    %35 = vector.broadcast %cst_17 : f32 to vector<8x8xf32>
    %36 = arith.mulf %35, %32 : vector<8x8xf32>
    %37 = arith.select %34, %32, %36 : vector<8x8xi1>, vector<8x8xf32>
    %c0_18 = arith.constant 0 : index
    %c0_19 = arith.constant 0 : index
    %c0_20 = arith.constant 0 : index
    %38 = vector.load %arg6[%c0_18, %c0_19, %c0_20] : memref<2x8x4xf32, #tpu.memory_space<vmem>>, vector<1x8x4xf32>
    %39 = vector.shape_cast %38 : vector<1x8x4xf32> to vector<8x4xf32>
    %cst_21 = arith.constant dense<0.000000e+00> : vector<8x4xf32>
    %40 = tpu.matmul %37, %39, %cst_21 {dimension_numbers = #tpu.dot_dimension_numbers<[1], [0], [0], [1], [0, 0, 1, 1], [], []>} : vector<8x8xf32>, vector<8x4xf32>, vector<8x4xf32> -> vector<8x4xf32>
    %41 = arith.addf %7, %40 : vector<8x4xf32>
    %c1 = arith.constant 1 : index
    %c0_22 = arith.constant 0 : index
    %c0_23 = arith.constant 0 : index
    %42 = vector.load %arg8[%c1, %c0_22, %c0_23] : memref<2x16x8xf32, #tpu.memory_space<vmem>>, vector<1x16x8xf32>
    %43 = vector.shape_cast %42 : vector<1x16x8xf32> to vector<16x8xf32>
    %c1_24 = arith.constant 1 : index
    %44 = arith.index_cast %6 : i32 to index
    %c0_25 = arith.constant 0 : index
    %45 = vector.load %arg8[%c1_24, %44, %c0_25] : memref<2x16x8xf32, #tpu.memory_space<vmem>>, vector<1x8x8xf32>
    %46 = vector.shape_cast %45 : vector<1x8x8xf32> to vector<8x8xf32>
    %cst_26 = arith.constant dense<0.000000e+00> : vector<8x16xf32>
    %47 = tpu.matmul %46, %43, %cst_26 {dimension_numbers = #tpu.dot_dimension_numbers<[1], [1], [0], [0], [0, 0, 1, 0], [], []>} : vector<8x8xf32>, vector<16x8xf32>, vector<8x16xf32> -> vector<8x16xf32>
    %48 = arith.mulf %47, %3 : vector<8x16xf32>
    %cst_27 = arith.constant 0.000000e+00 : f32
    %49 = vector.broadcast %cst_27 : f32 to vector<8x16xf32>
    %50 = arith.cmpf oeq, %48, %49 : vector<8x16xf32>
    %cst_28 = arith.constant -1.000000e+16 : f32
    %51 = vector.broadcast %cst_28 : f32 to vector<8x16xf32>
    %52 = arith.select %50, %51, %48 : vector<8x16xi1>, vector<8x16xf32>
    %cst_29 = arith.constant dense<0xFF800000> : vector<8xf32>
    %53 = vector.multi_reduction <maximumf>, %52, %cst_29 [1] : vector<8x16xf32> to vector<8xf32>
    %54 = vector.shape_cast %53 : vector<8xf32> to vector<8x1xf32>
    %55 = vector.broadcast %54 : vector<8x1xf32> to vector<8x16xf32>
    %56 = arith.subf %52, %55 : vector<8x16xf32>
    %57 = math.exp %56 : vector<8x16xf32>
    %cst_30 = arith.constant dense<0.000000e+00> : vector<8xf32>
    %58 = vector.multi_reduction <add>, %57, %cst_30 [1] : vector<8x16xf32> to vector<8xf32>
    %59 = vector.shape_cast %58 : vector<8xf32> to vector<8x1xf32>
    %60 = vector.broadcast %59 : vector<8x1xf32> to vector<8x16xf32>
    %61 = arith.divf %57, %60 : vector<8x16xf32>
    %cst_31 = arith.constant dense<0.000000e+00> : vector<8x8xf32>
    %62 = tpu.matmul %61, %43, %cst_31 {dimension_numbers = #tpu.dot_dimension_numbers<[1], [0], [0], [1], [0, 0, 1, 1], [], []>} : vector<8x16xf32>, vector<16x8xf32>, vector<8x8xf32> -> vector<8x8xf32>
    %63 = vector.extract_strided_slice %4 {offsets = [1, 0, 0], sizes = [1, 1, 8], strides = [1, 1, 1]} : vector<2x1x8xf32> to vector<1x1x8xf32>
    %64 = vector.shape_cast %63 : vector<1x1x8xf32> to vector<1x8xf32>
    %65 = vector.broadcast %64 : vector<1x8xf32> to vector<8x8xf32>
    %66 = arith.addf %62, %65 : vector<8x8xf32>
    %cst_32 = arith.constant 0.000000e+00 : f32
    %67 = vector.broadcast %cst_32 : f32 to vector<8x8xf32>
    %68 = arith.cmpf oge, %66, %67 : vector<8x8xf32>
    %cst_33 = arith.constant 0.00999999977 : f32
    %69 = vector.broadcast %cst_33 : f32 to vector<8x8xf32>
    %70 = arith.mulf %69, %66 : vector<8x8xf32>
    %71 = arith.select %68, %66, %70 : vector<8x8xi1>, vector<8x8xf32>
    %c1_34 = arith.constant 1 : index
    %c0_35 = arith.constant 0 : index
    %c0_36 = arith.constant 0 : index
    %72 = vector.load %arg6[%c1_34, %c0_35, %c0_36] : memref<2x8x4xf32, #tpu.memory_space<vmem>>, vector<1x8x4xf32>
    %73 = vector.shape_cast %72 : vector<1x8x4xf32> to vector<8x4xf32>
    %cst_37 = arith.constant dense<0.000000e+00> : vector<8x4xf32>
    %74 = tpu.matmul %71, %73, %cst_37 {dimension_numbers = #tpu.dot_dimension_numbers<[1], [0], [0], [1], [0, 0, 1, 1], [], []>} : vector<8x8xf32>, vector<8x4xf32>, vector<8x4xf32> -> vector<8x4xf32>
    %75 = arith.addf %41, %74 : vector<8x4xf32>
    %c0_38 = arith.constant 0 : index
    %c0_39 = arith.constant 0 : index
    %c0_40 = arith.constant 0 : index
    %76 = vector.load %arg7[%c0_38, %c0_39, %c0_40] : memref<1x8x4xf32, #tpu.memory_space<vmem>>, vector<1x8x4xf32>
    %77 = vector.shape_cast %76 : vector<1x8x4xf32> to vector<8x4xf32>
    %78 = vector.shape_cast %75 : vector<8x4xf32> to vector<1x8x4xf32>
    tpu.vector_store %arg7[%c0_38, %c0_39, %c0_40], %78 {strides = array<i32>} : memref<1x8x4xf32, #tpu.memory_space<vmem>>, vector<1x8x4xf32>,
    return
  }
  func.func @transform_0(%arg0: i32, %arg1: i32) -> (i32, i32, i32) {
    %c0_i32 = arith.constant 0 : i32
    %c0_i32_0 = arith.constant 0 : i32
    %c0_i32_1 = arith.constant 0 : i32
    return %arg0, %c0_i32, %c0_i32_0 : i32, i32, i32
  }
  func.func @transform_1(%arg0: i32, %arg1: i32) -> (i32, i32) {
    %c0_i32 = arith.constant 0 : i32
    %c0_i32_0 = arith.constant 0 : i32
    return %arg1, %c0_i32 : i32, i32
  }
  func.func @transform_2(%arg0: i32, %arg1: i32) -> (i32, i32) {
    %c0_i32 = arith.constant 0 : i32
    %c0_i32_0 = arith.constant 0 : i32
    %c0_i32_1 = arith.constant 0 : i32
    return %c0_i32, %c0_i32_0 : i32, i32
  }
  func.func @transform_3(%arg0: i32, %arg1: i32) -> (i32, i32, i32) {
    %c0_i32 = arith.constant 0 : i32
    %c0_i32_0 = arith.constant 0 : i32
    %c0_i32_1 = arith.constant 0 : i32
    %c0_i32_2 = arith.constant 0 : i32
    return %c0_i32, %c0_i32_0, %c0_i32_1 : i32, i32, i32
  }
  func.func @transform_4(%arg0: i32, %arg1: i32) -> (i32, i32, i32) {
    %c0_i32 = arith.constant 0 : i32
    %c0_i32_0 = arith.constant 0 : i32
    %c0_i32_1 = arith.constant 0 : i32
    %c0_i32_2 = arith.constant 0 : i32
    return %c0_i32, %c0_i32_0, %c0_i32_1 : i32, i32, i32
  }
  func.func @transform_5(%arg0: i32, %arg1: i32) -> (i32, i32, i32) {
    %c0_i32 = arith.constant 0 : i32
    %c0_i32_0 = arith.constant 0 : i32
    return %arg0, %arg1, %c0_i32 : i32, i32, i32
  }
}

</mosaic_0001>

<bundles_post_ra>
// kernel: gat_subnet_forward.3
= control target key start
LH: loop header
LB: loop body
LE: loop exit
PB: predicated region body
PF: predicated region fallthrough
CT: control target
= control target key end

     0   :  { %s643_s12 = smov 0   ;;  %s645_s13 = smov 0   ;;  %s715_s0 = inlined_call_operand.vmem [shape: f32[2,16,4], index: 0, kind: input, shape index: {}]   ;;  %s716_s1 = inlined_call_operand.vmem [shape: f32[16,16], index: 1, kind: input, shape index: {}]   ;;  %s717_s2 = inlined_call_operand.vmem [shape: f32[1,4], index: 2, kind: input, shape index: {}]   ;;  %s718_s3 = inlined_call_operand.vmem [shape: f32[2,16,4], index: 3, kind: output, shape index: {}]  }
   0x1   :  { %s647_s14 = smov 0   ;;  %s649_s15 = smov 0  }
   0x2   :  { %s651_s16 = smov 0  }
   0x3 LB: > { %s22_s17 = sadd.s32 1, %s610_s14  ;;  %s25_s18 = sadd.s32 1, %s614_s15  ;;  %s618_s16 = sphi %s651_s16, %s13_s16   ;;  %s614_s15 = sphi %s649_s15, %s722_s15   ;;  %s610_s14 = sphi %s647_s14, %s721_s14   ;;  %s606_s13 = sphi %s645_s13, %s720_s13   ;;  %s602_s12 = sphi %s643_s12, %s719_s12  }
   0x4   : > { %p23_p0 = scmp.ge.s32.totalorder %s22_s17, 2  ;;  %p491_p1 = scmp.ge.s32.totalorder %s618_s16, 1 }
   0x5   : > { %p160_p2 = scmp.lt.s32.totalorder %s618_s16, 5 }
   0x6   : > { %s724_s17 = smov (%p23_p0, %s22_s17), 0  ;;  %s726_s18 = smov (!%p23_p0, %s25_s18), %s614_s15 }
   0x7   : > { %p161_p3 = pnand %p491_p1, %p160_p2  ;;  %p27_p4 = scmp.ge.s32.totalorder %s726_s18, 2 }
   0x8   : > { %p191_p5 = scmp.lt.s32.totalorder (!%p161_p3), %s606_s13, 1  ;;  %v620_v0 = vmov (!%p161_p3), 0.0|0.0   ;;  %vm621_vm0 = vmmov (!%p161_p3), 0   ;;  %v622_v1 = vmov (!%p161_p3), 0.0   ;;  %p196_p6 = scmp.lt.s32.totalorder (!%p161_p3), %s602_s12, 1  ;;  %vm214_vm1 = vcmask (!%p161_p3), 31744  }
   0x9   : > { %s728_s18 = smov (%p27_p4, %s726_s18), 0  ;;  %164 = sbr.rel (%p161_p3) target bundleno = 778 (0x30a), region = 32 }
   0xa   : > { %526 = vmatprep.subr.bf16.mxu0 (!%p161_p3), %v620_v0  ;;  %516 = vmatprep.mubr.msk.f32.mxu0 (!%p161_p3), %vm621_vm0, %v622_v1  ;;  %vm528_vm2 = vmpackc.low (!%p161_p3), %vm214_vm1, %vm214_vm1  ;;  %s497_s25 = sshll.u32 (!%p161_p3), %s602_s12, 3  ;;  %vm297_vm3 = vcmask (!%p161_p3), 130048   ;;  %v501_v20 = vld [vmem:[%s717_s2] ss:$0 sm:$0xff] (!%p161_p3) }
   0xb   : > { %530 = vmatprep.subr.bf16.mxu1 (!%p161_p3), %v620_v0  ;;  %523 = vmatprep.mubr.msk.f32.mxu1 (!%p161_p3), %vm621_vm0, %v622_v1 }
  0x10   : > { %s730_s13 = smov (!%p191_p5, %s606_s13), 1 }
  0x11   : > { %s197_s19 = scalar_select %p196_p6, %s602_s12, 1 }
  0x12   : > { %s505_s20 = sshll.u32 %s730_s13, 4  ;;  %s495_s21 = sshll.u32 %s730_s13, 1 }
  0x13   : > { %s195_s24 = scalar_lea.vmem %s715_s0, %s505_s20  ;;  %s683_s26 = sadd.s32 %s495_s21, %s197_s19 }
  0x14   : > { %v209_v2 = vld [vmem:[%s195_s24] sm:$0xff]  ;;  %v210_v3 = vld [vmem:[%s195_s24 + $0x8] sm:$0xff]  ;;  %s211_s27 = scalar_lea.vmem %s195_s24, %s497_s25  ;;  %s494_s28 = sshll.u32 %s197_s19, 3 }
  0x15   : > { %v527_v4 = vpack.c.bf16 %v210_v3, %v209_v2  ;;  %v212_v5 = vld [vmem:[%s211_s27] sm:$0xff]  ;;  %s199_s4 = scalar_lea.vmem %s716_s1, %s494_s28  ;;  %s496_s7 = sshll.u32 %s683_s26, 3 }
  0x16   : > { %v213_v6 = vld [vmem:[%s199_s4] sm:$0xff]  ;;  %s207_s10 = scalar_lea.vmem %s718_s3, %s496_s7 }
  0x17   : > { %529 = vmatpush3.bf16.xpose.msk.msra.mxu0 %vm528_vm2, %v527_v4  ;;  %532 = vmatpush3.bf16.msra.mxu1 %v527_v4 }
  0x1e   : > { %517 = vmatmul.mubr.msk.f32.vlgmr.msra.gmra.mrb[0].mxu0 %vm214_vm1, %v212_v5 }
  0xf1   : > { %v290_v7 = vpop.f32.mrb[0].mxu0 }
  0xf2   : > { %v294_v8 = vmul.f32 %v290_v7, %v213_v6  ;;  %v518_v9 = vpop.f32.mrb[1].mxu0 }
  0xf4   : > { %vm295_vm4 = vcmp.eq.f32.partialorder %v294_v8, 0.0 }
  0xf5   : > { %v296_v10 = vsel %vm295_vm4, -1e+16, %v294_v8 }
  0xf6   : > { %v298_v11 = vsel %vm297_vm3, %v296_v10, -inf }
  0xf7   : > { %299 = vmax.xlane.f32.xlu0 %v298_v11 }
 0x184   : > { %v300_v12 = vpop.xlane.xlu0 %299 }
 0x185   : > { %v301_v13 = vsub.f32 %v296_v10, %v300_v12 }
 0x187   : > { %v302_v14 = vmul.f32 1.442695, %v301_v13 }
 0x189   : > { %576 = vpow2.f32 %v302_v14 }
 0x193   : > { %v577_v15 = vpop.eup %576 }
 0x194   : > { %v304_v16 = vsel %vm297_vm3, %v577_v15, 0.0 }
 0x195   : > { %305 = vadd.xlane.f32.xlu0 %v304_v16 }
 0x222   : > { %v306_v17 = vpop.xlane.xlu0 %305 }
 0x223   : > { %578 = vrcp.f32 %v306_v17 }
 0x22d   : > { %v579_v18 = vpop.eup %578 }
 0x22e   : > { %v308_v19 = vmul.f32 %v579_v18, %v577_v15 }
 0x230   : > { %524 = vmatmul.mubr.msk.f32.vlgmr.msra.gmra.mrb[0].mxu1 %vm297_vm3, %v308_v19 }
 0x303   : > { %v385_v21 = vpop.f32.mrb[0].mxu1 }
 0x304   : > { %v386_v22 = vadd.f32 %v501_v20, %v385_v21  ;;  %v525_v23 = vpop.f32.mrb[1].mxu1 }
 0x306   : > { %vm389_vm5 = vcmp.ge.f32.partialorder %v386_v22, 0.0  ;;  %v390_v24 = vmul.f32 0.01, %v386_v22 }
 0x308   : > { %v391_v25 = vsel %vm389_vm5, %v386_v22, %v390_v24 }
 0x309   : > { %392 = vst.msk [vmem:[%s207_s10] sm:$0xff] %vm214_vm1, %v391_v25 }
 0x30a PF: > { %s13_s16 = sadd.s32 1, %s618_s16   ;;  %s719_s12 = smov %s610_s14 }
 0x30b   : > { %p10_p7 = scmp.ge.s32.totalorder %s13_s16, 6   ;;  %s720_s13 = smov %s614_s15 }
 0x30c   : > { %s721_s14 = smov %s724_s17  ;;  %s722_s15 = smov %s728_s18 }
 0x30d   :  { %12 = sbr.rel (!%p10_p7) target bundleno = 3 (0x3), region = 66 }

// kernel: gat_subnet_forward.2
= control target key start
LH: loop header
LB: loop body
LE: loop exit
PB: predicated region body
PF: predicated region fallthrough
CT: control target
= control target key end

     0   :  { %s1220_s18 = smov 0   ;;  %s1222_s19 = smov 0   ;;  %s1339_s0 = inlined_call_operand.vmem [shape: f32[2,16,4], index: 0, kind: input, shape index: {}]   ;;  %s1340_s1 = inlined_call_operand.vmem [shape: f32[16,16], index: 1, kind: input, shape index: {}]   ;;  %s1341_s2 = inlined_call_operand.vmem [shape: f32[4,16], index: 2, kind: input, shape index: {}]   ;;  %s1342_s3 = inlined_call_operand.vmem [shape: f32[2,1,8], index: 3, kind: input, shape index: {}]   ;;  %s1343_s4 = inlined_call_operand.vmem [shape: f32[2,8,4], index: 4, kind: input, shape index: {}]   ;;  %s1344_s5 = inlined_call_operand.vmem [shape: f32[2,16,4], index: 5, kind: output, shape index: {}]  }
   0x1   :  { %s1224_s20 = smov 0   ;;  %s1226_s21 = smov 0  }
   0x2   :  { %s1228_s22 = smov 0  }
   0x3 LB: > { %s24_s23 = sadd.s32 1, %s1176_s20  ;;  %s27_s24 = sadd.s32 1, %s1180_s21  ;;  %s1184_s22 = sphi %s1228_s22, %s15_s22   ;;  %s1180_s21 = sphi %s1226_s21, %s1350_s21   ;;  %s1176_s20 = sphi %s1224_s20, %s1349_s20   ;;  %s1172_s19 = sphi %s1222_s19, %s1348_s19   ;;  %s1168_s18 = sphi %s1220_s18, %s1347_s18  }
   0x4   : > { %p25_p0 = scmp.ge.s32.totalorder %s24_s23, 2  ;;  %p987_p1 = scmp.ge.s32.totalorder %s1184_s22, 1 }
   0x5   : > { %p210_p2 = scmp.lt.s32.totalorder %s1184_s22, 5 }
   0x6   : > { %s1352_s23 = smov (%p25_p0, %s24_s23), 0  ;;  %s1354_s24 = smov (!%p25_p0, %s27_s24), %s1180_s21 }
   0x7   : > { %p211_p3 = pnand %p987_p1, %p210_p2  ;;  %p29_p4 = scmp.ge.s32.totalorder %s1354_s24, 2 }
   0x8   : > { %p245_p5 = scmp.lt.s32.totalorder (!%p211_p3), %s1172_s19, 1  ;;  %p250_p6 = scmp.lt.s32.totalorder (!%p211_p3), %s1168_s18, 1 }
   0x9   : > { %s1356_s24 = smov (%p29_p4, %s1354_s24), 0  ;;  %214 = sbr.rel (%p211_p3) target bundleno = 1871 (0x74f), region = 40 }
   0xa   : > { %p993_p7 = scmp.ne.s32.totalorder (!%p211_p3), %s1168_s18, 0 }
  0x10   : > { %s1358_s19 = smov (!%p245_p5, %s1172_s19), 1  ;;  %265 = sbr.rel (%p993_p7) target bundleno = 355 (0x163), region = 44 }
  0x11   : > { %s251_s25 = scalar_select %p250_p6, %s1168_s18, 1 }
  0x12   : > { %s1015_s26 = sshll.u32 %s1358_s19, 4  ;;  %s991_s27 = sshll.u32 %s1358_s19, 1  ;;  %v268_v0 = vld [vmem:[%s1341_s2] sm:$0xf] (!%p993_p7)  ;;  %vm276_vm0 = vcmask (!%p993_p7), 1043456   ;;  %vm269_vm1 = vcmask (!%p993_p7), 31744  }
  0x13   : > { %s249_s30 = scalar_lea.vmem %s1339_s0, %s1015_s26  ;;  %s990_s6 = sshll.u32 %s251_s25, 3  ;;  %1035 = vmatprep.subr.msk.mxu0 (!%p993_p7), %vm276_vm0, %v268_v0  ;;  %vm355_vm2 = vcmask (!%p993_p7), 64512  }
  0x14   : > { %s1260_s9 = scalar_lea.vmem %s1340_s1, %s990_s6  ;;  %s259_s10 = sadd.s32 %s991_s27, %s251_s25  ;;  %v266_v1 = vld [vmem:[%s249_s30] sm:$0xff] (!%p993_p7)  ;;  %v267_v2 = vld [vmem:[%s249_s30 + $0x8] sm:$0xff] (!%p993_p7)  ;;  %1036 = vmatpush3.msk.msra.mxu0 (!%p993_p7), %vm276_vm0, %v268_v0 }
  0x15   : > { %s992_s11 = sshll.u32 %s259_s10, 3  ;;  %1037 = vmatprep.mubr.msk.f32.mxu0 (!%p993_p7), %vm269_vm1, %v266_v1  ;;  %s1186_s17 = smov (!%p993_p7), 120  }
  0x16   : > { %s1265_s14 = scalar_lea.vmem %s1344_s5, %s992_s11  ;;  %1038 = vmatmul.mubr.msk.f32.vlgmr.msra.gmra.mrb[0].mxu0 (!%p993_p7), %vm269_vm1, %v267_v2 }
  0xe9   : > { %v1039_v3 = vpop.f32.mrb[0].mxu0 }
  0xea   : > { %357 = vst.msk [vmem:[#allocation2 + $0x8] sm:$0xff] %vm355_vm2, %v1039_v3  ;;  %v346_v4 = vpop.f32.mrb[1].mxu0 }
  0xeb   : > { %356 = vst.msk [vmem:[#allocation2] sm:$0xff] %vm355_vm2, %v346_v4  ;;  %360 = vrot.lane.b32.xlu0 %v346_v4, %s1186_s17 }
  0xef   : > { %362 = vrot.lane.b32.xlu0 %v1039_v3, %s1186_s17 }
 0x15d   : > { %v361_v5 = vpop.permute.xlu0 %360 }
 0x15e   : > { %367 = vst.msk [vmem:[#allocation2 + $0x10] sm:$0xff] %vm355_vm2, %v361_v5 }
 0x161   : > { %v363_v6 = vpop.permute.xlu0 %362 }
 0x162   : > { %368 = vst.msk [vmem:[#allocation2 + $0x18] sm:$0xff] %vm355_vm2, %v363_v6 }
 0x163 PF: > { %v373_v7 = vld [vmem:[#allocation2] sm:$0xff]  ;;  %v374_v8 = vld [vmem:[#allocation2 + $0x8] sm:$0xff]  ;;  %vm377_vm3 = vcmask 64512   ;;  %v1187_v9 = vmov 0.0|0.0   ;;  %vm1188_vm5 = vmmov 0   ;;  %v1189_v12 = vmov 0.0  }
 0x164   : > { %1078 = vmatprep.subr.bf16.mxu0 %v1187_v9  ;;  %v1079_v10 = vpack.c.bf16 %v374_v8, %v373_v7  ;;  %vm1273_vm4 = vmpackc.low %vm377_vm3, %vm377_vm3  ;;  %1044 = vmatprep.mubr.msk.f32.mxu0 %vm1188_vm5, %v1189_v12  ;;  %s997_s19 = sshll.u32 %s1168_s18, 3  ;;  %v369_v14 = vld [vmem:[%s1260_s9] sm:$0xff]  ;;  %vm460_vm6 = vcmask 130048   ;;  %v1010_v47 = vld [vmem:[%s1343_s4 + $0x8] sm:$0xff]  ;;  %vm884_vm11 = vcmask 31744  }
 0x165   : > { %1082 = vmatprep.subr.bf16.mxu1 %v1187_v9  ;;  %1051 = vmatprep.mubr.msk.f32.mxu1 %vm1188_vm5, %v1189_v12  ;;  %s1285_s25 = scalar_lea.vmem [#allocation2], %s997_s19  ;;  %v556_v26 = vld [vmem:[#allocation2 + $0x10] sm:$0xff]  ;;  %v1008_v48 = vld [vmem:[%s1342_s3 + $0x1] ss:$0 sm:$0xff]  ;;  %v1001_v52 = vld [vmem:[%s1342_s3] ss:$0 sm:$0xff] }
 0x166   : > { %1081 = vmatpush3.bf16.xpose.msk.msra.mxu0 %vm1273_vm4, %v1079_v10  ;;  %1084 = vmatpush3.bf16.msra.mxu1 %v1079_v10  ;;  %v554_v54 = vld [vmem:[%s1343_s4] sm:$0xff] }
 0x167   : > { %1085 = vmatprep.subr.bf16.mxu1 %v1187_v9  ;;  %1068 = vmatprep.subr.mxu0 %v1189_v12 }
 0x169   : > { %v376_v13 = vld [vmem:[%s1285_s25] sm:$0xff]  ;;  %v557_v27 = vld [vmem:[#allocation2 + $0x18] sm:$0xff]  ;;  %v1004_v31 = vld [vmem:[%s1285_s25 + $0x10] sm:$0xff] }
 0x16a   : > { %v1086_v29 = vpack.c.bf16 %v557_v27, %v556_v26 }
 0x16d   : > { %1045 = vmatmul.mubr.msk.f32.vlgmr.msra.gmra.mrb[0].mxu0 %vm377_vm3, %v376_v13 }
 0x16e   : > { %1070 = vmatprep.mubr.msk.f32.mxu0 %vm1188_vm5, %v1189_v12  ;;  %1069 = vmatpush3.msra.mxu0 %v1010_v47 }
 0x16f   : > { %1073 = vmatprep.subr.mxu0 %v1189_v12 }
 0x240   : > { %v453_v15 = vpop.f32.mrb[0].mxu0 }
 0x241   : > { %v457_v16 = vmul.f32 %v453_v15, %v369_v14  ;;  %v1046_v17 = vpop.f32.mrb[1].mxu0 }
 0x243   : > { %vm458_vm7 = vcmp.eq.f32.partialorder %v457_v16, 0.0 }
 0x244   : > { %v459_v18 = vsel %vm458_vm7, -1e+16, %v457_v16 }
 0x245   : > { %v461_v19 = vsel %vm460_vm6, %v459_v18, -inf }
 0x246   : > { %462 = vmax.xlane.f32.xlu0 %v461_v19 }
 0x2d3   : > { %v463_v20 = vpop.xlane.xlu0 %462 }
 0x2d4   : > { %v464_v21 = vsub.f32 %v459_v18, %v463_v20 }
 0x2d6   : > { %v465_v22 = vmul.f32 1.442695, %v464_v21 }
 0x2d8   : > { %1138 = vpow2.f32 %v465_v22 }
 0x2e2   : > { %v1139_v23 = vpop.eup %1138 }
 0x2e3   : > { %v467_v24 = vsel %vm460_vm6, %v1139_v23, 0.0 }
 0x2e4   : > { %468 = vadd.xlane.f32.xlu0 %v467_v24 }
 0x371   : > { %v469_v25 = vpop.xlane.xlu0 %468 }
 0x372   : > { %1140 = vrcp.f32 %v469_v25 }
 0x37c   : > { %v1141_v28 = vpop.eup %1140 }
 0x37d   : > { %v471_v30 = vmul.f32 %v1141_v28, %v1139_v23 }
 0x37f   : > { %1052 = vmatmul.mubr.msk.f32.vlgmr.msra.gmra.mrb[0].mxu1 %vm460_vm6, %v471_v30 }
 0x380   : > { %1088 = vmatpush3.bf16.xpose.msk.msra.mxu1 %vm1273_vm4, %v1086_v29  ;;  %1058 = vmatprep.mubr.msk.f32.mxu1 %vm1188_vm5, %v1189_v12 }
 0x381   : > { %1089 = vmatprep.subr.bf16.mxu1 %v1187_v9 }
 0x387   : > { %1059 = vmatmul.mubr.msk.f32.vlgmr.msra.gmra.mrb[2].mxu1 %vm377_vm3, %v1004_v31 }
 0x388   : > { %1091 = vmatpush3.bf16.msra.mxu1 %v1086_v29  ;;  %1065 = vmatprep.mubr.msk.f32.mxu1 %vm1188_vm5, %v1189_v12 }
 0x452   : > { %v547_v32 = vpop.f32.mrb[0].mxu1 }
 0x453   : > { %v1053_v33 = vpop.f32.mrb[1].mxu1  ;;  %v548_v55 = vadd.f32 %v1001_v52, %v547_v32 }
 0x455   : > { %v552_v57 = vmul.f32 0.01, %v548_v55  ;;  %vm551_vm10 = vcmp.ge.f32.partialorder %v548_v55, 0.0 }
 0x457   : > { %v553_v58 = vsel %vm551_vm10, %v548_v55, %v552_v57 }
 0x45a   : > { %v636_v34 = vpop.f32.mrb[2].mxu1 }
 0x45b   : > { %v640_v35 = vmul.f32 %v636_v34, %v369_v14  ;;  %v1060_v36 = vpop.f32.mrb[3].mxu1 }
 0x45d   : > { %vm641_vm8 = vcmp.eq.f32.partialorder %v640_v35, 0.0 }
 0x45e   : > { %v642_v37 = vsel %vm641_vm8, -1e+16, %v640_v35 }
 0x45f   : > { %v643_v38 = vsel %vm460_vm6, %v642_v37, -inf }
 0x460   : > { %644 = vmax.xlane.f32.xlu1 %v643_v38 }
 0x4ed   : > { %v645_v39 = vpop.xlane.xlu1 %644 }
 0x4ee   : > { %v646_v40 = vsub.f32 %v642_v37, %v645_v39 }
 0x4f0   : > { %v647_v41 = vmul.f32 1.442695, %v646_v40 }
 0x4f2   : > { %1142 = vpow2.f32 %v647_v41 }
 0x4fc   : > { %v1143_v42 = vpop.eup %1142 }
 0x4fd   : > { %v649_v43 = vsel %vm460_vm6, %v1143_v42, 0.0 }
 0x4fe   : > { %650 = vadd.xlane.f32.xlu1 %v649_v43 }
 0x58b   : > { %v651_v44 = vpop.xlane.xlu1 %650 }
 0x58c   : > { %1144 = vrcp.f32 %v651_v44 }
 0x596   : > { %v1145_v45 = vpop.eup %1144 }
 0x597   : > { %v653_v46 = vmul.f32 %v1145_v45, %v1143_v42 }
 0x599   : > { %1066 = vmatmul.mubr.msk.f32.vlgmr.msra.gmra.mrb[4].mxu1 %vm460_vm6, %v653_v46 }
 0x66c   : > { %v729_v49 = vpop.f32.mrb[4].mxu1 }
 0x66d   : > { %v730_v50 = vadd.f32 %v1008_v48, %v729_v49  ;;  %v1067_v51 = vpop.f32.mrb[5].mxu1 }
 0x66f   : > { %vm733_vm9 = vcmp.ge.f32.partialorder %v730_v50, 0.0  ;;  %v734_v53 = vmul.f32 0.01, %v730_v50 }
 0x671   : > { %v735_v56 = vsel %vm733_vm9, %v730_v50, %v734_v53 }
 0x672   : > { %1071 = vmatmul.mubr.msk.f32.vlgmr.msra.gmra.mrb[2].mxu0 %vm377_vm3, %v735_v56 }
 0x673   : > { %1074 = vmatpush3.msra.mxu0 %v554_v54  ;;  %1075 = vmatprep.mubr.msk.f32.mxu0 %vm1188_vm5, %v1189_v12 }
 0x67a   : > { %1076 = vmatmul.mubr.msk.f32.vlgmr.msra.gmra.mrb[2].mxu0 %vm377_vm3, %v553_v58 }
 0x74d   : > { %v880_v59 = vpop.f32.mrb[2].mxu0 }
 0x74e   : > { %885 = vst.msk [vmem:[%s1265_s14] sm:$0xff] %vm884_vm11, %v880_v59  ;;  %v1077_v60 = vpop.f32.mrb[3].mxu0 }
 0x74f PF: > { %s15_s22 = sadd.s32 1, %s1184_s22   ;;  %s1347_s18 = smov %s1176_s20 }
 0x750   : > { %p12_p8 = scmp.ge.s32.totalorder %s15_s22, 6   ;;  %s1348_s19 = smov %s1180_s21 }
 0x751   : > { %s1349_s20 = smov %s1352_s23  ;;  %s1350_s21 = smov %s1356_s24 }
 0x752   :  { %14 = sbr.rel (!%p12_p8) target bundleno = 3 (0x3), region = 82 }

</bundles_post_ra>
